<compile_context>
chip_gen: v6e
topology: v6e:2x2x1
jax: 0.10.0
libtpu: 0.0.40
codegen_flags: <defaults>
</compile_context>

<pallas_src>
import functools

import jax
import jax.numpy as jnp
from jax.experimental import pallas as pl
from jax.experimental.pallas import tpu as pltpu

ALPHA = 1.0
GAMMA = 2

_PALLAS_MIN_ELEMENTS = 1 << 20  # below this, plain XLA fusion wins


def _focal_loss_kernel(logits_ref, targets_ref, out_ref, acc_ref,
                       *, n_total, alpha, gamma, inv_n):
    """One batch tile per grid step; scalar focal-loss sum accumulated in VMEM."""
    i = pl.program_id(0)

    @pl.when(i == 0)
    def _init():
        acc_ref[...] = jnp.zeros_like(acc_ref)

    x = logits_ref[...].astype(jnp.float32)          # (TILE_N, C)
    t = targets_ref[...]                              # (TILE_N, 1) int32
    tile_n = x.shape[0]

    # Numerically stable log-sum-exp.
    m = jnp.max(x, axis=-1, keepdims=True)                                   # (TILE_N, 1)
    lse = m + jnp.log(jnp.sum(jnp.exp(x - m), axis=-1, keepdims=True))       # (TILE_N, 1)

    # Gather the target-class logit via a one-hot mask (no dynamic gather on TPU).
    cls = jax.lax.broadcasted_iota(jnp.int32, x.shape, 1)                    # (TILE_N, C)
    tgt_logit = jnp.sum(jnp.where(cls == t, x, 0.0), axis=-1, keepdims=True)  # (TILE_N, 1)

    ce = lse - tgt_logit                              # per-sample CE, (TILE_N, 1)
    pt = jnp.exp(-ce)
    w = 1.0 - pt
    wg = jnp.ones_like(w)
    for _ in range(gamma):                            # integer gamma -> explicit VPU muls
        wg = wg * w
    focal = (alpha * wg) * ce                         # (TILE_N, 1)

    # Mask padded tail rows (rows beyond the true batch size).
    row = i * tile_n + jax.lax.broadcasted_iota(jnp.int32, (tile_n, 1), 0)
    focal = jnp.where(row < n_total, focal, 0.0)

    acc_ref[...] += jnp.sum(focal, axis=0, keepdims=True)   # (1, 1)

    @pl.when(i == pl.num_programs(0) - 1)
    def _finalize():
        out_ref[...] = acc_ref[...] * inv_n


def _focal_loss_ref(logits, targets, alpha=ALPHA, gamma=GAMMA):
    """Plain-JAX reference / small-input fast path (same math as torch)."""
    logp = jax.nn.log_softmax(logits.astype(jnp.float32), axis=-1)
    ce = -jnp.take_along_axis(logp, targets.astype(jnp.int32)[:, None], axis=-1)[:, 0]
    pt = jnp.exp(-ce)
    return jnp.mean(alpha * (1.0 - pt) ** gamma * ce)


def focal_loss(logits, targets, alpha=ALPHA, gamma=GAMMA,
               force_pallas=False, tile_n=None):
    """logits: (N, C) float (f32 or bf16); targets: (N,) int class ids. Returns scalar."""
    n, c = logits.shape

    if not force_pallas and n * c < _PALLAS_MIN_ELEMENTS:
        # Launch overhead of a pallas_call dwarfs ~KB of work; let XLA fuse it.
        return _focal_loss_ref(logits, targets, alpha, gamma)

    # --- Tile sizing: amortize per-step overhead, stay under v7x VMEM budget. ---
    if tile_n is None:
        bytes_per_row = c * jnp.dtype(logits.dtype).itemsize
        per_buffer_budget = 12 * 1024 * 1024          # x2 buffers ~ 24 MiB of logits
        tile_n = (per_buffer_budget // max(bytes_per_row, 1)) // 8 * 8
        tile_n = max(8, min(1024, tile_n))
        tile_n = min(tile_n, ((n + 7) // 8) * 8)      # don't over-pad tiny batches
    tile_n = max(8, (tile_n // 8) * 8)

    n_pad = ((n + tile_n - 1) // tile_n) * tile_n
    if n_pad != n:
        logits = jnp.pad(logits, ((0, n_pad - n), (0, 0)))
        targets = jnp.pad(targets, (0, n_pad - n))
    targets2d = targets.astype(jnp.int32).reshape(n_pad, 1)

    grid = (n_pad // tile_n,)
    kernel = functools.partial(
        _focal_loss_kernel,
        n_total=n, alpha=float(alpha), gamma=int(gamma), inv_n=1.0 / n,
    )

    out = pl.pallas_call(
        kernel,
        out_shape=jax.ShapeDtypeStruct((1, 1), jnp.float32),
        grid_spec=pltpu.PrefetchScalarGridSpec(
            num_scalar_prefetch=0,
            grid=grid,
            in_specs=[
                pl.BlockSpec((tile_n, c), lambda i: (i, 0)),   # logits tile
                pl.BlockSpec((tile_n, 1), lambda i: (i, 0)),   # target ids tile
            ],
            out_specs=pl.BlockSpec((1, 1), lambda i: (0, 0)),  # resident accumulator tile
            scratch_shapes=[pltpu.VMEM((1, 1), jnp.float32)],
        ),
        compiler_params=pltpu.CompilerParams(
            dimension_semantics=("arbitrary",),       # sequential reduction over batch tiles
            vmem_limit_bytes=40 * 1024 * 1024,        # > v5e default 16 MiB, safe on v7x 64 MiB
        ),
    )(logits, targets2d)
    return out[0, 0]


if __name__ == "__main__":
    key = jax.random.PRNGKey(0)
    k1, k2, k3, k4 = jax.random.split(key, 4)

    # --- Check 1: small classification-head shapes, single-tile grid. ---
    N, C = 8, 32
    logits = jax.random.normal(k1, (N, C), dtype=jnp.float32)
    targets = jax.random.randint(k2, (N,), 0, C, dtype=jnp.int32)

    loss = focal_loss(logits, targets, force_pallas=True)
    jax.block_until_ready(loss)
    ref = _focal_loss_ref(logits, targets)
    assert jnp.allclose(loss, ref, rtol=1e-5, atol=1e-5), (loss, ref)

    # --- Check 2: multi-tile grid with a masked tail tile (N not multiple of tile). ---
    N2, C2 = 20, 128
    logits2 = jax.random.normal(k3, (N2, C2), dtype=jnp.bfloat16)
    targets2 = jax.random.randint(k4, (N2,), 0, C2, dtype=jnp.int32)

    loss2 = focal_loss(logits2, targets2, force_pallas=True, tile_n=8)
    jax.block_until_ready(loss2)
    ref2 = _focal_loss_ref(logits2, targets2)
    assert jnp.allclose(loss2, ref2, rtol=2e-2, atol=2e-2), (loss2, ref2)

    print("KERNEL_OK")
</pallas_src>

<mosaic_0001>
module attributes {stable_mosaic.version = 11 : i64} {
  func.func @_focal_loss_kernel(%arg0: i32, %arg1: memref<8x32xf32, #tpu.memory_space<vmem>>, %arg2: memref<8x1xi32, #tpu.memory_space<vmem>>, %arg3: memref<1x1xf32, #tpu.memory_space<vmem>>, %arg4: memref<1x1xf32, #tpu.memory_space<vmem>>) attributes {dimension_semantics = [#tpu.dimension_semantics<arbitrary>], iteration_bounds = array<i64: 1>, scalar_prefetch = 0 : i64, scratch_operands = 1 : i64, tpu.core_type = #tpu.core_type<tc>, window_params = [{transform_indices = @transform_0, window_bounds = array<i64: 8, 32>}, {transform_indices = @transform_1, window_bounds = array<i64: 8, 1>}, {pipeline_mode = #tpu.pipeline_mode<synchronous>, transform_indices = @transform_2, window_bounds = array<i64: 1, 1>}]} {
    %c0_i32 = arith.constant 0 : i32
    %0 = arith.cmpi eq, %arg0, %c0_i32 : i32
    %1 = arith.extui %0 : i1 to i32
    %c0_i32_0 = arith.constant 0 : i32
    %2 = arith.cmpi ne, %1, %c0_i32_0 : i32
    scf.if %2 {
      %cst_20 = arith.constant 0.000000e+00 : f32
      %49 = vector.broadcast %cst_20 : f32 to vector<1x1xf32>
      %c0_21 = arith.constant 0 : index
      %c0_22 = arith.constant 0 : index
      %50 = vector.load %arg4[%c0_21, %c0_22] : memref<1x1xf32, #tpu.memory_space<vmem>>, vector<1x1xf32>
      tpu.vector_store %arg4[%c0_21, %c0_22], %49 {strides = array<i32>} : memref<1x1xf32, #tpu.memory_space<vmem>>, vector<1x1xf32>,
    } else {
    }
    %c0 = arith.constant 0 : index
    %c0_1 = arith.constant 0 : index
    %3 = vector.load %arg1[%c0, %c0_1] : memref<8x32xf32, #tpu.memory_space<vmem>>, vector<8x32xf32>
    %c0_2 = arith.constant 0 : index
    %c0_3 = arith.constant 0 : index
    %4 = vector.load %arg2[%c0_2, %c0_3] : memref<8x1xi32, #tpu.memory_space<vmem>>, vector<8x1xi32>
    %cst = arith.constant dense<0xFF800000> : vector<8xf32>
    %5 = vector.multi_reduction <maximumf>, %3, %cst [1] : vector<8x32xf32> to vector<8xf32>
    %6 = vector.shape_cast %5 : vector<8xf32> to vector<8x1xf32>
    %7 = vector.broadcast %6 : vector<8x1xf32> to vector<8x32xf32>
    %8 = arith.subf %3, %7 : vector<8x32xf32>
    %9 = math.exp %8 : vector<8x32xf32>
    %cst_4 = arith.constant dense<0.000000e+00> : vector<8xf32>
    %10 = vector.multi_reduction <add>, %9, %cst_4 [1] : vector<8x32xf32> to vector<8xf32>
    %11 = vector.shape_cast %10 : vector<8xf32> to vector<8x1xf32>
    %12 = math.log %11 : vector<8x1xf32>
    %13 = arith.addf %6, %12 : vector<8x1xf32>
    %14 = tpu.iota {dimensions = array<i32: 1>} : vector<8x32xi32>
    %15 = vector.broadcast %4 : vector<8x1xi32> to vector<8x32xi32>
    %16 = arith.cmpi eq, %14, %15 : vector<8x32xi32>
    %cst_5 = arith.constant 0.000000e+00 : f32
    %17 = vector.broadcast %cst_5 : f32 to vector<8x32xf32>
    %18 = arith.select %16, %3, %17 : vector<8x32xi1>, vector<8x32xf32>
    %cst_6 = arith.constant dense<0.000000e+00> : vector<8xf32>
    %19 = vector.multi_reduction <add>, %18, %cst_6 [1] : vector<8x32xf32> to vector<8xf32>
    %20 = vector.shape_cast %19 : vector<8xf32> to vector<8x1xf32>
    %21 = arith.subf %13, %20 : vector<8x1xf32>
    %cst_7 = arith.constant 0.000000e+00 : f32
    %22 = vector.broadcast %cst_7 : f32 to vector<8x1xf32>
    %23 = arith.subf %22, %21 : vector<8x1xf32>
    %24 = math.exp %23 : vector<8x1xf32>
    %cst_8 = arith.constant 1.000000e+00 : f32
    %25 = vector.broadcast %cst_8 : f32 to vector<8x1xf32>
    %26 = arith.subf %25, %24 : vector<8x1xf32>
    %cst_9 = arith.constant 1.000000e+00 : f32
    %27 = vector.broadcast %cst_9 : f32 to vector<8x1xf32>
    %28 = arith.mulf %27, %26 : vector<8x1xf32>
    %29 = arith.mulf %28, %26 : vector<8x1xf32>
    %cst_10 = arith.constant 1.000000e+00 : f32
    %30 = vector.broadcast %cst_10 : f32 to vector<8x1xf32>
    %31 = arith.mulf %30, %29 : vector<8x1xf32>
    %32 = arith.mulf %31, %21 : vector<8x1xf32>
    %c8_i32 = arith.constant 8 : i32
    %33 = arith.muli %arg0, %c8_i32 : i32
    %34 = tpu.iota {dimensions = array<i32: 0>} : vector<8x1xi32>
    %35 = vector.broadcast %33 : i32 to vector<8x1xi32>
    %36 = arith.addi %35, %34 : vector<8x1xi32>
    %c8_i32_11 = arith.constant 8 : i32
    %37 = vector.broadcast %c8_i32_11 : i32 to vector<8x1xi32>
    %38 = arith.cmpi slt, %36, %37 : vector<8x1xi32>
    %cst_12 = arith.constant 0.000000e+00 : f32
    %39 = vector.broadcast %cst_12 : f32 to vector<8x1xf32>
    %40 = arith.select %38, %32, %39 : vector<8x1xi1>, vector<8x1xf32>
    %c0_13 = arith.constant 0 : index
    %c0_14 = arith.constant 0 : index
    %41 = vector.load %arg4[%c0_13, %c0_14] : memref<1x1xf32, #tpu.memory_space<vmem>>, vector<1x1xf32>
    %cst_15 = arith.constant dense<0.000000e+00> : vector<1xf32>
    %42 = vector.multi_reduction <add>, %40, %cst_15 [0] : vector<8x1xf32> to vector<1xf32>
    %43 = vector.shape_cast %42 : vector<1xf32> to vector<1x1xf32>
    %44 = arith.addf %41, %43 : vector<1x1xf32>
    %c0_16 = arith.constant 0 : index
    %c0_17 = arith.constant 0 : index
    %45 = vector.load %arg4[%c0_16, %c0_17] : memref<1x1xf32, #tpu.memory_space<vmem>>, vector<1x1xf32>
    tpu.vector_store %arg4[%c0_16, %c0_17], %44 {strides = array<i32>} : memref<1x1xf32, #tpu.memory_space<vmem>>, vector<1x1xf32>,
    %c0_i32_18 = arith.constant 0 : i32
    %46 = arith.cmpi eq, %arg0, %c0_i32_18 : i32
    %47 = arith.extui %46 : i1 to i32
    %c0_i32_19 = arith.constant 0 : i32
    %48 = arith.cmpi ne, %47, %c0_i32_19 : i32
    scf.if %48 {
      %c0_20 = arith.constant 0 : index
      %c0_21 = arith.constant 0 : index
      %49 = vector.load %arg4[%c0_20, %c0_21] : memref<1x1xf32, #tpu.memory_space<vmem>>, vector<1x1xf32>
      %cst_22 = arith.constant 1.250000e-01 : f32
      %50 = vector.broadcast %cst_22 : f32 to vector<1x1xf32>
      %51 = arith.mulf %49, %50 : vector<1x1xf32>
      %c0_23 = arith.constant 0 : index
      %c0_24 = arith.constant 0 : index
      %52 = vector.load %arg3[%c0_23, %c0_24] : memref<1x1xf32, #tpu.memory_space<vmem>>, vector<1x1xf32>
      tpu.vector_store %arg3[%c0_23, %c0_24], %51 {strides = array<i32>} : memref<1x1xf32, #tpu.memory_space<vmem>>, vector<1x1xf32>,
    } else {
    }
    return
  }
  func.func @transform_0(%arg0: i32) -> (i32, i32) {
    %c0_i32 = arith.constant 0 : i32
    %c0_i32_0 = arith.constant 0 : i32
    return %arg0, %c0_i32 : i32, i32
  }
  func.func @transform_1(%arg0: i32) -> (i32, i32) {
    %c0_i32 = arith.constant 0 : i32
    %c0_i32_0 = arith.constant 0 : i32
    return %arg0, %c0_i32 : i32, i32
  }
  func.func @transform_2(%arg0: i32) -> (i32, i32) {
    %c0_i32 = arith.constant 0 : i32
    %c0_i32_0 = arith.constant 0 : i32
    %c0_i32_1 = arith.constant 0 : i32
    return %c0_i32, %c0_i32_0 : i32, i32
  }
}

</mosaic_0001>

<bundles_post_ra>
// kernel: tpu_custom_call.1
= control target key start
LH: loop header
LB: loop body
LE: loop exit
PB: predicated region body
PF: predicated region fallthrough
CT: control target
= control target key end

     0   :  { %vm20_vm0 = vcmask 261120   ;;  %s152_s0 = inlined_call_operand.vmem [shape: f32[8,32], index: 0, kind: input, shape index: {}]   ;;  %s153_s1 = inlined_call_operand.vmem [shape: s32[8,1], index: 1, kind: input, shape index: {}]   ;;  %s154_s2 = inlined_call_operand.hbm [shape: f32[1,1], index: 2, kind: output, shape index: {}]  }
   0x1   :  { %v18_v0 = vld [vmem:[%s152_s0] sm:$0xff] }
   0x2   :  { %7 = vsyncpa [#allocation4], 0  ;;  %v21_v1 = vsel %vm20_vm0, %v18_v0, -inf  ;;  %v119_v2 = vmov 0   ;;  %v19_v3 = vld [vmem:[%s153_s1] sm:$0xff]  ;;  %v33_v7 = vlaneseq  ;;  %vm16_vm2 = vcmask 0  }
   0x3   :  { %90 = vset.pattern.permute.xlu0 %v119_v2  ;;  %v120_v14 = vmov 0.0   ;;  %s121_s0 = smov [#allocation3]  }
   0x4   :  { %22 = vmax.xlane.f32.xlu0 %v21_v1  ;;  %v34_v8 = vand.u32 127, %v33_v7  ;;  %17 = vst.msk [vmem:[#allocation2] sm:$0x1] %vm16_vm2, %v120_v14  ;;  %s79_s1 = sshll.u32 %s121_s0, 4  ;;  %s80_s1 = int_to_ptr.vmem [resolvable:$true] %s79_s1 }
   0x5   :  { %s97_s13 = scalar_lea.vmem %s80_s1, 16  ;;  %s101_s14 = scalar_lea.vmem %s80_s1, 32 }
   0x6   :  { %p98_p0 = scmp.ne.s32.totalorder %s80_s1, %s97_s13  ;;  %p102_p1 = scmp.lt.s32.totalorder %s80_s1, %s80_s1 }
   0x7   :  { %p103_p2 = scmp.lt.s32.totalorder %s101_s14, %s97_s13 }
   0x9   :  { %p104_p3 = por %p103_p2, %p102_p1 }
   0xb   :  { %v57_v32 = vld [vmem:[#allocation2] sm:$0x1]  ;;  %p105_p4 = pnand %p104_p3, %p98_p0 }
  0x1a   :  { %36 = vperm.xlu0 %90, %v19_v3  }
  0x8d   :  { %v23_v4 = vpop.xlane.xlu0 %22 }
  0x8e   :  { %v24_v5 = vsub.f32 %v18_v0, %v23_v4 }
  0x90   :  { %v25_v6 = vmul.f32 1.442695, %v24_v5 }
  0x92   :  { %91 = vpow2.f32 %v25_v6 }
  0x95   :  { %v37_v9 = vpop.permute.xlu0 %36 }
  0x96   :  { %vm38_vm1 = vcmp.eq.s32.totalorder %v34_v8, %v37_v9 }
  0x97   :  { %v39_v11 = vsel %vm38_vm1, %v18_v0, 0.0 }
  0x98   :  { %v40_v13 = vsel %vm20_vm0, %v39_v11, 0.0 }
  0x9f   :  { %v92_v10 = vpop.eup %91 }
  0xa0   :  { %v27_v12 = vsel %vm20_vm0, %v92_v10, 0.0 }
  0xa1   :  { %28 = vadd.xlane.f32.xlu1 %v27_v12 }
  0xa5   :  { %41 = vadd.xlane.f32.xlu1 %v40_v13 }
 0x12a   :  { %v29_v15 = vpop.xlane.xlu1 %28 }
 0x12b   :  { %93 = vlog2.f32 %v29_v15 }
 0x12e   :  { %v42_v18 = vpop.xlane.xlu1 %41 }
 0x138   :  { %v94_v16 = vpop.eup %93 }
 0x139   :  { %v31_v17 = vmul.f32 0.6931472, %v94_v16 }
 0x13b   :  { %v32_v19 = vadd.f32 %v31_v17, %v23_v4 }
 0x13d   :  { %v43_v20 = vsub.f32 %v32_v19, %v42_v18 }
 0x13f   :  { %v44_v21 = vsub.f32 0.0, %v43_v20 }
 0x141   :  { %v45_v22 = vmul.f32 1.442695, %v44_v21 }
 0x143   :  { %95 = vpow2.f32 %v45_v22 }
 0x150   :  { %v96_v23 = vpop.eup %95 }
 0x151   :  { %v47_v24 = vsub.f32 1.0, %v96_v23 }
 0x153   :  { %v48_v25 = vmul.f32 %v47_v24, %v47_v24 }
 0x155   :  { %v49_v26 = vmul.f32 %v48_v25, %v43_v20 }
 0x157   :  { %v58_v27 = vrot.slane %v49_v26, 4 }
 0x159   :  { %v59_v28 = vadd.f32 %v58_v27, %v49_v26 }
 0x15b   :  { %v60_v29 = vrot.slane %v59_v28, 2 }
 0x15d   :  { %v61_v30 = vadd.f32 %v60_v29, %v59_v28 }
 0x15f   :  { %v62_v31 = vrot.slane %v61_v30, 1 }
 0x161   :  { %v63_v33 = vadd.f32 %v62_v31, %v61_v30 }
 0x163   :  { %v64_v34 = vadd.f32 %v63_v33, %v57_v32 }
 0x165   :  { %66 = vst.msk [vmem:[#allocation2] sm:$0x1] %vm16_vm2, %v64_v34 }
 0x16c   :  { %v70_v35 = vld [vmem:[#allocation2] sm:$0x1] }
 0x16d   :  { %v71_v36 = vmul.f32 0.125, %v70_v35 }
 0x16f   :  { %72 = vst.msk [vmem:[#allocation3] sm:$0x1] %vm16_vm2, %v71_v36 }
 0x170   :  { %108 = shalt.err (!%p105_p4)
}
 0x171   :  { %82 = dma.vmem_to_hbm [thread:$0]  %s80_s1, 16, %s154_s2, [#allocation4]  }
 0x172   :  { %117 = dma.done.wait [#allocation4], 16  }
 0x173   :  { %118 = vsyncadd [#allocation4], 4294967280 }
 0x174   :  { %86 = vsyncpa [#allocation4], 1 }

</bundles_post_ra>
